<compile_context>
chip_gen: v7x
topology: tpu7x:2x2x1
jax: 0.10.0
libtpu: 0.0.40
codegen_flags: <defaults>
</compile_context>

<pallas_src>
import functools

import jax
import jax.numpy as jnp
from jax.experimental import pallas as pl
from jax.experimental.pallas import tpu as pltpu


INPUT_DIM = 10
LATENT_DIM = 10
HIDDEN_DIM = 128


def _vae_kernel(
    x_ref, eps_ref,           # [TB, D], [TB, L]
    w1_ref, b1_ref,           # encoder layer 0: [D, H], [1, H]
    w2_ref, b2_ref,           # encoder layer 2: [H, 2L], [1, 2L]
    w3_ref, b3_ref,           # decoder layer 0: [L, H], [1, H]
    w4_ref, b4_ref,           # decoder layer 2: [H, D], [1, D]
    out_ref,                  # packed output: [TB, D + 2L] = [dec | mu | log_var]
    *, latent_dim,
):
    L = latent_dim
    x = x_ref[...]

    # Encoder: Linear -> ReLU -> Linear (single [H, 2L] matmul, slice in-vreg)
    h = jnp.dot(x, w1_ref[...], preferred_element_type=jnp.float32) + b1_ref[...]
    h = jnp.maximum(h, 0.0)
    enc = jnp.dot(h, w2_ref[...], preferred_element_type=jnp.float32) + b2_ref[...]
    mu = enc[:, :L]
    log_var = enc[:, L:]

    # Reparameterization trick (clamp only affects std; unclamped log_var is returned)
    lv_clamped = jnp.clip(log_var, -10.0, 10.0)
    std = jnp.exp(0.5 * lv_clamped)
    z = mu + eps_ref[...] * std

    # Decoder: Linear -> ReLU -> Linear
    h2 = jnp.dot(z, w3_ref[...], preferred_element_type=jnp.float32) + b3_ref[...]
    h2 = jnp.maximum(h2, 0.0)
    dec = jnp.dot(h2, w4_ref[...], preferred_element_type=jnp.float32) + b4_ref[...]

    # Pack the three narrow outputs into one denser store slab (one DMA per tile).
    out_ref[...] = jnp.concatenate([dec, mu, log_var], axis=-1).astype(out_ref.dtype)


def _xavier_uniform(key, fan_in, fan_out):
    # Matches nn.init.xavier_uniform_ bound = sqrt(6 / (fan_in + fan_out)).
    bound = (6.0 / (fan_in + fan_out)) ** 0.5
    return jax.random.uniform(
        key, (fan_in, fan_out), dtype=jnp.float32, minval=-bound, maxval=bound
    )


def init_vae_params(key, input_dim=INPUT_DIM, latent_dim=LATENT_DIM, hidden=HIDDEN_DIM):
    k1, k2, k3, k4 = jax.random.split(key, 4)
    return {
        # encoder (weights stored as [in, out] so kernel computes x @ W + b)
        "w1": _xavier_uniform(k1, input_dim, hidden),
        "b1": jnp.zeros((1, hidden), jnp.float32),
        "w2": _xavier_uniform(k2, hidden, 2 * latent_dim),
        "b2": jnp.zeros((1, 2 * latent_dim), jnp.float32),
        # decoder
        "w3": _xavier_uniform(k3, latent_dim, hidden),
        "b3": jnp.zeros((1, hidden), jnp.float32),
        "w4": _xavier_uniform(k4, hidden, input_dim),
        "b4": jnp.zeros((1, input_dim), jnp.float32),
    }


@functools.partial(jax.jit, static_argnames=("latent_dim", "block_batch"))
def vae_forward(params, x, eps, latent_dim=LATENT_DIM, block_batch=256):
    """Runs the VAE forward pass in one batch-tiled Pallas kernel.

    Returns (decoded, mu, log_var).
    """
    B, D = x.shape
    H = params["w1"].shape[1]
    L = latent_dim
    OUT = D + 2 * L

    # --- batch tiling: pad batch to a multiple of the (sublane-aligned) tile ---
    TB = max(8, (min(block_batch, ((B + 7) // 8) * 8) // 8) * 8)
    B_pad = ((B + TB - 1) // TB) * TB
    if B_pad != B:
        pad = B_pad - B
        x = jnp.pad(x, ((0, pad), (0, 0)))
        eps = jnp.pad(eps, ((0, pad), (0, 0)))

    grid = (B_pad // TB,)

    # Batch-tiled specs for activations; weights/biases held resident in VMEM
    # across grid steps via a constant index_map.
    def batch_spec(feat):
        return pl.BlockSpec((TB, feat), lambda i: (i, 0))

    def resident_spec(shape):
        return pl.BlockSpec(shape, lambda i: (0, 0))

    in_specs = [
        batch_spec(D),                       # x
        batch_spec(L),                       # eps
        resident_spec(params["w1"].shape),   # w1
        resident_spec(params["b1"].shape),   # b1
        resident_spec(params["w2"].shape),   # w2 (full [H, 2L])
        resident_spec(params["b2"].shape),   # b2
        resident_spec(params["w3"].shape),   # w3
        resident_spec(params["b3"].shape),   # b3
        resident_spec(params["w4"].shape),   # w4
        resident_spec(params["b4"].shape),   # b4
    ]
    out_specs = batch_spec(OUT)

    # Honest (tiny) cost hint so XLA schedules this call as cheap.
    flops = 2 * B_pad * (D * H + H * 2 * L + L * H + H * D)
    transcendentals = B_pad * L  # exp in the reparameterization
    weight_bytes = 4 * (D * H + H + H * 2 * L + 2 * L + L * H + H + H * D + D)
    bytes_accessed = 4 * B_pad * (D + L + OUT) + weight_bytes

    packed = pl.pallas_call(
        functools.partial(_vae_kernel, latent_dim=L),
        out_shape=jax.ShapeDtypeStruct((B_pad, OUT), jnp.float32),
        grid=grid,
        in_specs=in_specs,
        out_specs=out_specs,
        compiler_params=pltpu.CompilerParams(
            dimension_semantics=("parallel",),
        ),
        cost_estimate=pl.CostEstimate(
            flops=flops,
            transcendentals=transcendentals,
            bytes_accessed=bytes_accessed,
        ),
    )(
        x, eps,
        params["w1"], params["b1"],
        params["w2"], params["b2"],
        params["w3"], params["b3"],
        params["w4"], params["b4"],
    )

    decoded = packed[:B, :D]
    mu = packed[:B, D:D + L]
    log_var = packed[:B, D + L:]
    return decoded, mu, log_var


def _reference_forward(params, x, eps, latent_dim=LATENT_DIM):
    """Pure-JAX reference mirroring the PyTorch module."""
    h = jnp.maximum(x @ params["w1"] + params["b1"], 0.0)
    enc = h @ params["w2"] + params["b2"]
    mu, log_var = enc[:, :latent_dim], enc[:, latent_dim:]
    lv_c = jnp.clip(log_var, -10.0, 10.0)
    z = mu + eps * jnp.exp(0.5 * lv_c)
    h2 = jnp.maximum(z @ params["w3"] + params["b3"], 0.0)
    dec = h2 @ params["w4"] + params["b4"]
    return dec, mu, log_var


def _check(params, x, eps, **kw):
    dec, mu, lv = vae_forward(params, x, eps, **kw)
    jax.block_until_ready((dec, mu, lv))
    ref_dec, ref_mu, ref_lv = _reference_forward(params, x, eps)
    assert jnp.allclose(dec, ref_dec, atol=1e-5, rtol=1e-5)
    assert jnp.allclose(mu, ref_mu, atol=1e-5, rtol=1e-5)
    assert jnp.allclose(lv, ref_lv, atol=1e-5, rtol=1e-5)


if __name__ == "__main__":
    key = jax.random.PRNGKey(0)
    k_params, k_x, k_eps, k_x2, k_eps2 = jax.random.split(key, 5)

    params = init_vae_params(k_params)

    # Small shape consistent with the module (single batch tile).
    B = 8
    x = jax.random.normal(k_x, (B, INPUT_DIM), dtype=jnp.float32)
    # eps ~ N(0, 1), drawn outside the kernel (mirrors torch.randn_like, deterministic here).
    eps = jax.random.normal(k_eps, (B, LATENT_DIM), dtype=jnp.float32)
    _check(params, x, eps)

    # Exercise the multi-tile batch grid + padding path (3 grid steps, ragged batch).
    B2 = 37
    x2 = jax.random.normal(k_x2, (B2, INPUT_DIM), dtype=jnp.float32)
    eps2 = jax.random.normal(k_eps2, (B2, LATENT_DIM), dtype=jnp.float32)
    _check(params, x2, eps2, block_batch=16)

    print("KERNEL_OK")
</pallas_src>

<mosaic_0001>
module attributes {stable_mosaic.version = 11 : i64} {
  func.func @_vae_kernel(%arg0: i32, %arg1: memref<8x10xf32, #tpu.memory_space<vmem>>, %arg2: memref<8x10xf32, #tpu.memory_space<vmem>>, %arg3: memref<10x128xf32, #tpu.memory_space<vmem>>, %arg4: memref<1x128xf32, #tpu.memory_space<vmem>>, %arg5: memref<128x20xf32, #tpu.memory_space<vmem>>, %arg6: memref<1x20xf32, #tpu.memory_space<vmem>>, %arg7: memref<10x128xf32, #tpu.memory_space<vmem>>, %arg8: memref<1x128xf32, #tpu.memory_space<vmem>>, %arg9: memref<128x10xf32, #tpu.memory_space<vmem>>, %arg10: memref<1x10xf32, #tpu.memory_space<vmem>>, %arg11: memref<8x30xf32, #tpu.memory_space<vmem>>) attributes {dimension_semantics = [#tpu.dimension_semantics<parallel>], iteration_bounds = array<i64: 1>, scalar_prefetch = 0 : i64, scratch_operands = 0 : i64, tpu.core_type = #tpu.core_type<tc>, window_params = [{transform_indices = @transform_0, window_bounds = array<i64: 8, 10>}, {transform_indices = @transform_1, window_bounds = array<i64: 8, 10>}, {pipeline_mode = #tpu.pipeline_mode<synchronous>, transform_indices = @transform_2, window_bounds = array<i64: 10, 128>}, {pipeline_mode = #tpu.pipeline_mode<synchronous>, transform_indices = @transform_3, window_bounds = array<i64: 1, 128>}, {pipeline_mode = #tpu.pipeline_mode<synchronous>, transform_indices = @transform_4, window_bounds = array<i64: 128, 20>}, {pipeline_mode = #tpu.pipeline_mode<synchronous>, transform_indices = @transform_5, window_bounds = array<i64: 1, 20>}, {pipeline_mode = #tpu.pipeline_mode<synchronous>, transform_indices = @transform_6, window_bounds = array<i64: 10, 128>}, {pipeline_mode = #tpu.pipeline_mode<synchronous>, transform_indices = @transform_7, window_bounds = array<i64: 1, 128>}, {pipeline_mode = #tpu.pipeline_mode<synchronous>, transform_indices = @transform_8, window_bounds = array<i64: 128, 10>}, {pipeline_mode = #tpu.pipeline_mode<synchronous>, transform_indices = @transform_9, window_bounds = array<i64: 1, 10>}, {transform_indices = @transform_10, window_bounds = array<i64: 8, 30>}]} {
    %c0 = arith.constant 0 : index
    %c0_0 = arith.constant 0 : index
    %0 = vector.load %arg1[%c0, %c0_0] : memref<8x10xf32, #tpu.memory_space<vmem>>, vector<8x10xf32>
    %c0_1 = arith.constant 0 : index
    %c0_2 = arith.constant 0 : index
    %1 = vector.load %arg3[%c0_1, %c0_2] : memref<10x128xf32, #tpu.memory_space<vmem>>, vector<10x128xf32>
    %cst = arith.constant dense<0.000000e+00> : vector<8x128xf32>
    %2 = tpu.matmul %0, %1, %cst {dimension_numbers = #tpu.dot_dimension_numbers<[1], [0], [0], [1], [0, 0, 1, 1], [], []>} : vector<8x10xf32>, vector<10x128xf32>, vector<8x128xf32> -> vector<8x128xf32>
    %c0_3 = arith.constant 0 : index
    %c0_4 = arith.constant 0 : index
    %3 = vector.load %arg4[%c0_3, %c0_4] : memref<1x128xf32, #tpu.memory_space<vmem>>, vector<1x128xf32>
    %4 = vector.broadcast %3 : vector<1x128xf32> to vector<8x128xf32>
    %5 = arith.addf %2, %4 : vector<8x128xf32>
    %cst_5 = arith.constant 0.000000e+00 : f32
    %6 = vector.broadcast %cst_5 : f32 to vector<8x128xf32>
    %7 = arith.maximumf %5, %6 : vector<8x128xf32>
    %c0_6 = arith.constant 0 : index
    %c0_7 = arith.constant 0 : index
    %8 = vector.load %arg5[%c0_6, %c0_7] : memref<128x20xf32, #tpu.memory_space<vmem>>, vector<128x20xf32>
    %cst_8 = arith.constant dense<0.000000e+00> : vector<8x20xf32>
    %9 = tpu.matmul %7, %8, %cst_8 {dimension_numbers = #tpu.dot_dimension_numbers<[1], [0], [0], [1], [0, 0, 1, 1], [], []>} : vector<8x128xf32>, vector<128x20xf32>, vector<8x20xf32> -> vector<8x20xf32>
    %c0_9 = arith.constant 0 : index
    %c0_10 = arith.constant 0 : index
    %10 = vector.load %arg6[%c0_9, %c0_10] : memref<1x20xf32, #tpu.memory_space<vmem>>, vector<1x20xf32>
    %11 = vector.broadcast %10 : vector<1x20xf32> to vector<8x20xf32>
    %12 = arith.addf %9, %11 : vector<8x20xf32>
    %13 = vector.extract_strided_slice %12 {offsets = [0, 0], sizes = [8, 10], strides = [1, 1]} : vector<8x20xf32> to vector<8x10xf32>
    %14 = vector.extract_strided_slice %12 {offsets = [0, 10], sizes = [8, 10], strides = [1, 1]} : vector<8x20xf32> to vector<8x10xf32>
    %cst_11 = arith.constant -1.000000e+01 : f32
    %cst_12 = arith.constant 1.000000e+01 : f32
    %15 = vector.broadcast %cst_11 : f32 to vector<8x10xf32>
    %16 = arith.maximumf %15, %14 : vector<8x10xf32>
    %17 = vector.broadcast %cst_12 : f32 to vector<8x10xf32>
    %18 = arith.minimumf %17, %16 : vector<8x10xf32>
    %cst_13 = arith.constant 5.000000e-01 : f32
    %19 = vector.broadcast %cst_13 : f32 to vector<8x10xf32>
    %20 = arith.mulf %19, %18 : vector<8x10xf32>
    %21 = math.exp %20 : vector<8x10xf32>
    %c0_14 = arith.constant 0 : index
    %c0_15 = arith.constant 0 : index
    %22 = vector.load %arg2[%c0_14, %c0_15] : memref<8x10xf32, #tpu.memory_space<vmem>>, vector<8x10xf32>
    %23 = arith.mulf %22, %21 : vector<8x10xf32>
    %24 = arith.addf %13, %23 : vector<8x10xf32>
    %c0_16 = arith.constant 0 : index
    %c0_17 = arith.constant 0 : index
    %25 = vector.load %arg7[%c0_16, %c0_17] : memref<10x128xf32, #tpu.memory_space<vmem>>, vector<10x128xf32>
    %cst_18 = arith.constant dense<0.000000e+00> : vector<8x128xf32>
    %26 = tpu.matmul %24, %25, %cst_18 {dimension_numbers = #tpu.dot_dimension_numbers<[1], [0], [0], [1], [0, 0, 1, 1], [], []>} : vector<8x10xf32>, vector<10x128xf32>, vector<8x128xf32> -> vector<8x128xf32>
    %c0_19 = arith.constant 0 : index
    %c0_20 = arith.constant 0 : index
    %27 = vector.load %arg8[%c0_19, %c0_20] : memref<1x128xf32, #tpu.memory_space<vmem>>, vector<1x128xf32>
    %28 = vector.broadcast %27 : vector<1x128xf32> to vector<8x128xf32>
    %29 = arith.addf %26, %28 : vector<8x128xf32>
    %cst_21 = arith.constant 0.000000e+00 : f32
    %30 = vector.broadcast %cst_21 : f32 to vector<8x128xf32>
    %31 = arith.maximumf %29, %30 : vector<8x128xf32>
    %c0_22 = arith.constant 0 : index
    %c0_23 = arith.constant 0 : index
    %32 = vector.load %arg9[%c0_22, %c0_23] : memref<128x10xf32, #tpu.memory_space<vmem>>, vector<128x10xf32>
    %cst_24 = arith.constant dense<0.000000e+00> : vector<8x10xf32>
    %33 = tpu.matmul %31, %32, %cst_24 {dimension_numbers = #tpu.dot_dimension_numbers<[1], [0], [0], [1], [0, 0, 1, 1], [], []>} : vector<8x128xf32>, vector<128x10xf32>, vector<8x10xf32> -> vector<8x10xf32>
    %c0_25 = arith.constant 0 : index
    %c0_26 = arith.constant 0 : index
    %34 = vector.load %arg10[%c0_25, %c0_26] : memref<1x10xf32, #tpu.memory_space<vmem>>, vector<1x10xf32>
    %35 = vector.broadcast %34 : vector<1x10xf32> to vector<8x10xf32>
    %36 = arith.addf %33, %35 : vector<8x10xf32>
    %37 = tpu.concatenate %36, %13, %14 in 1 : vector<8x10xf32>, vector<8x10xf32>, vector<8x10xf32> -> vector<8x30xf32>
    %c0_27 = arith.constant 0 : index
    %c0_28 = arith.constant 0 : index
    %38 = vector.load %arg11[%c0_27, %c0_28] : memref<8x30xf32, #tpu.memory_space<vmem>>, vector<8x30xf32>
    tpu.vector_store %arg11[%c0_27, %c0_28], %37 {strides = array<i32>} : memref<8x30xf32, #tpu.memory_space<vmem>>, vector<8x30xf32>,
    return
  }
  func.func @transform_0(%arg0: i32) -> (i32, i32) {
    %c0_i32 = arith.constant 0 : i32
    %c0_i32_0 = arith.constant 0 : i32
    return %arg0, %c0_i32 : i32, i32
  }
  func.func @transform_1(%arg0: i32) -> (i32, i32) {
    %c0_i32 = arith.constant 0 : i32
    %c0_i32_0 = arith.constant 0 : i32
    return %arg0, %c0_i32 : i32, i32
  }
  func.func @transform_2(%arg0: i32) -> (i32, i32) {
    %c0_i32 = arith.constant 0 : i32
    %c0_i32_0 = arith.constant 0 : i32
    %c0_i32_1 = arith.constant 0 : i32
    return %c0_i32, %c0_i32_0 : i32, i32
  }
  func.func @transform_3(%arg0: i32) -> (i32, i32) {
    %c0_i32 = arith.constant 0 : i32
    %c0_i32_0 = arith.constant 0 : i32
    %c0_i32_1 = arith.constant 0 : i32
    return %c0_i32, %c0_i32_0 : i32, i32
  }
  func.func @transform_4(%arg0: i32) -> (i32, i32) {
    %c0_i32 = arith.constant 0 : i32
    %c0_i32_0 = arith.constant 0 : i32
    %c0_i32_1 = arith.constant 0 : i32
    return %c0_i32, %c0_i32_0 : i32, i32
  }
  func.func @transform_5(%arg0: i32) -> (i32, i32) {
    %c0_i32 = arith.constant 0 : i32
    %c0_i32_0 = arith.constant 0 : i32
    %c0_i32_1 = arith.constant 0 : i32
    return %c0_i32, %c0_i32_0 : i32, i32
  }
  func.func @transform_6(%arg0: i32) -> (i32, i32) {
    %c0_i32 = arith.constant 0 : i32
    %c0_i32_0 = arith.constant 0 : i32
    %c0_i32_1 = arith.constant 0 : i32
    return %c0_i32, %c0_i32_0 : i32, i32
  }
  func.func @transform_7(%arg0: i32) -> (i32, i32) {
    %c0_i32 = arith.constant 0 : i32
    %c0_i32_0 = arith.constant 0 : i32
    %c0_i32_1 = arith.constant 0 : i32
    return %c0_i32, %c0_i32_0 : i32, i32
  }
  func.func @transform_8(%arg0: i32) -> (i32, i32) {
    %c0_i32 = arith.constant 0 : i32
    %c0_i32_0 = arith.constant 0 : i32
    %c0_i32_1 = arith.constant 0 : i32
    return %c0_i32, %c0_i32_0 : i32, i32
  }
  func.func @transform_9(%arg0: i32) -> (i32, i32) {
    %c0_i32 = arith.constant 0 : i32
    %c0_i32_0 = arith.constant 0 : i32
    %c0_i32_1 = arith.constant 0 : i32
    return %c0_i32, %c0_i32_0 : i32, i32
  }
  func.func @transform_10(%arg0: i32) -> (i32, i32) {
    %c0_i32 = arith.constant 0 : i32
    %c0_i32_0 = arith.constant 0 : i32
    return %arg0, %c0_i32 : i32, i32
  }
}

</mosaic_0001>

<bundles_post_ra>
// kernel: vae_forward.1
= control target key start
LH: loop header
LB: loop body
LE: loop exit
PB: predicated region body
PF: predicated region fallthrough
CT: control target
= control target key end

     0   :  { %vm49_vm0 = vcmask 1041408   ;;  %v618_v0 = vmov 0.0|0.0   ;;  %vm619_vm1 = vmmov 1   ;;  %vm620_vm3 = vmmov 0   ;;  %s623_s13 = smov 10   ;;  %s845_s2 = inlined_call_operand.vmem [shape: f32[10,128], index: 2, kind: input, shape index: {}]   ;;  %s846_s4 = inlined_call_operand.vmem [shape: f32[128,20], index: 4, kind: input, shape index: {}]   ;;  %s847_s0 = inlined_call_operand.vmem [shape: f32[8,10], index: 0, kind: input, shape index: {}]   ;;  %s848_s3 = inlined_call_operand.vmem [shape: f32[1,128], index: 3, kind: input, shape index: {}]   ;;  %s849_s5 = inlined_call_operand.vmem [shape: f32[1,20], index: 5, kind: input, shape index: {}]   ;;  %s850_s6 = inlined_call_operand.vmem [shape: f32[10,128], index: 6, kind: input, shape index: {}]   ;;  %s851_s1 = inlined_call_operand.vmem [shape: f32[8,10], index: 1, kind: input, shape index: {}]   ;;  %s852_s8 = inlined_call_operand.vmem [shape: f32[128,10], index: 8, kind: input, shape index: {}]   ;;  %s853_s7 = inlined_call_operand.vmem [shape: f32[1,128], index: 7, kind: input, shape index: {}]   ;;  %s854_s9 = inlined_call_operand.vmem [shape: f32[1,10], index: 9, kind: input, shape index: {}]   ;;  %s855_s10 = inlined_call_operand.vmem [shape: f32[8,30], index: 10, kind: output, shape index: {}]  }
   0x1   :  { %554 = vmatprep.subr.bf16.mxu1 %v618_v0  ;;  %v36_v1 = vld [vmem:[%s845_s2] sm:$0xff]  ;;  %v37_v2 = vld [vmem:[%s845_s2 + $0x8] sm:$0x3]  ;;  %vm686_vm2 = vmpackc.low %vm49_vm0, %vm619_vm1  ;;  %582 = vmatprep.subr.bf16.mxu0 %v618_v0  ;;  %v621_v5 = vmov 0.0   ;;  %vm45_vm4 = vcmask 80896   ;;  %vm413_vm5 = vcmask 162816  }
   0x2   :  { %v555_v4 = vpack.c.bf16 %v37_v2, %v36_v1  ;;  %474 = vmatprep.mubr.msk.f32.mxu1 %vm620_vm3, %v621_v5  ;;  %v124_v6 = vld [vmem:[%s846_s4] sm:$0xff]  ;;  %v125_v7 = vld [vmem:[%s846_s4 + $0x8] sm:$0xff]  ;;  %516 = vmatprep.mubr.msk.f32.mxu0 %vm620_vm3, %v621_v5  ;;  %v126_v10 = vld [vmem:[%s846_s4 + $0x10] sm:$0xff]  ;;  %vm415_vm6 = vcmask 244736  }
   0x3   :  { %v35_v8 = vld [vmem:[%s847_s0] sm:$0xff]  ;;  %v559_v9 = vpack.c.bf16 %v125_v7, %v124_v6  ;;  %v127_v11 = vld [vmem:[%s846_s4 + $0x18] sm:$0xff]  ;;  %v129_v14 = vld [vmem:[%s846_s4 + $0x28] sm:$0xff] }
   0x4   :  { %557 = vmatpush3.bf16.msk.msra.mxu1 %vm686_vm2, %v555_v4  ;;  %v562_v12 = vpack.c.bf16 %v127_v11, %v126_v10  ;;  %v128_v13 = vld [vmem:[%s846_s4 + $0x20] sm:$0xff]  ;;  %v130_v16 = vld [vmem:[%s846_s4 + $0x30] sm:$0xff]  ;;  %v131_v17 = vld [vmem:[%s846_s4 + $0x38] sm:$0xff] }
   0x5   :  { %558 = vmatprep.subr.bf16.mxu1 %v618_v0  ;;  %v565_v15 = vpack.c.bf16 %v129_v14, %v128_v13  ;;  %v568_v18 = vpack.c.bf16 %v131_v17, %v130_v16  ;;  %v132_v19 = vld [vmem:[%s846_s4 + $0x40] sm:$0xff]  ;;  %v133_v20 = vld [vmem:[%s846_s4 + $0x48] sm:$0xff]  ;;  %v134_v22 = vld [vmem:[%s846_s4 + $0x50] sm:$0xff] }
   0x6   :  { %v571_v21 = vpack.c.bf16 %v133_v20, %v132_v19  ;;  %v135_v23 = vld [vmem:[%s846_s4 + $0x58] sm:$0xff]  ;;  %v136_v25 = vld [vmem:[%s846_s4 + $0x60] sm:$0xff]  ;;  %v137_v26 = vld [vmem:[%s846_s4 + $0x68] sm:$0xff] }
   0x7   :  { %475 = vmatmul.mubr.msk.f32.vlgmr.msra.gmra.mrb[0].mxu1 %vm45_vm4, %v35_v8  ;;  %v574_v24 = vpack.c.bf16 %v135_v23, %v134_v22  ;;  %v577_v27 = vpack.c.bf16 %v137_v26, %v136_v25  ;;  %v138_v28 = vld [vmem:[%s846_s4 + $0x70] sm:$0xff]  ;;  %v139_v29 = vld [vmem:[%s846_s4 + $0x78] sm:$0xff]  ;;  %v421_v31 = vld [vmem:[%s848_s3] ss:$0 sm:$0xff] }
   0x8   :  { %560 = vmatpush3.bf16.msra.mxu1 %v559_v9  ;;  %509 = vmatprep.mubr.msk.f32.mxu1 %vm620_vm3, %v621_v5  ;;  %v580_v30 = vpack.c.bf16 %v139_v29, %v138_v28  ;;  %v424_v36 = vld [vmem:[%s849_s5] ss:$0 sm:$0xff]  ;;  %v230_v43 = vld [vmem:[%s850_s6 + $0x8] sm:$0x3]  ;;  %s622_s5 = smov 118   ;;  %v317_v54 = vld [vmem:[%s852_s8 + $0x10] sm:$0xff] }
   0x9   :  { %561 = vmatprep.subr.bf16.mxu1 %v618_v0  ;;  %v229_v42 = vld [vmem:[%s850_s6] sm:$0xff]  ;;  %v316_v49 = vld [vmem:[%s852_s8 + $0x8] sm:$0xff]  ;;  %v318_v55 = vld [vmem:[%s852_s8 + $0x18] sm:$0xff] }
   0xa   :  { %v583_v44 = vpack.c.bf16 %v230_v43, %v229_v42  ;;  %v222_v47 = vld [vmem:[%s851_s1] sm:$0xff]  ;;  %v590_v56 = vpack.c.bf16 %v318_v55, %v317_v54  ;;  %v320_v58 = vld [vmem:[%s852_s8 + $0x28] sm:$0xff]  ;;  %v321_v60 = vld [vmem:[%s852_s8 + $0x30] sm:$0xff] }
   0xb   :  { %v315_v48 = vld [vmem:[%s852_s8] sm:$0xff]  ;;  %v322_v61 = vld [vmem:[%s852_s8 + $0x38] sm:$0xff]  ;;  %v324_v1 = vld [vmem:[%s852_s8 + $0x48] sm:$0xff] }
   0xc   :  { %563 = vmatpush3.bf16.msra.mxu1 %v562_v12  ;;  %585 = vmatpush3.bf16.msk.msra.mxu0 %vm686_vm2, %v583_v44  ;;  %v587_v52 = vpack.c.bf16 %v316_v49, %v315_v48  ;;  %v319_v57 = vld [vmem:[%s852_s8 + $0x20] sm:$0xff]  ;;  %v596_v62 = vpack.c.bf16 %v322_v61, %v321_v60  ;;  %v325_v3 = vld [vmem:[%s852_s8 + $0x50] sm:$0xff]  ;;  %v326_v4 = vld [vmem:[%s852_s8 + $0x58] sm:$0xff] }
   0xd   :  { %564 = vmatprep.subr.bf16.mxu1 %v618_v0  ;;  %586 = vmatprep.subr.bf16.mxu0 %v618_v0  ;;  %v593_v59 = vpack.c.bf16 %v320_v58, %v319_v57  ;;  %v323_v63 = vld [vmem:[%s852_s8 + $0x40] sm:$0xff]  ;;  %v328_v7 = vld [vmem:[%s852_s8 + $0x68] sm:$0xff]  ;;  %v329_v9 = vld [vmem:[%s852_s8 + $0x70] sm:$0xff] }
   0xe   :  { %v599_v2 = vpack.c.bf16 %v324_v1, %v323_v63  ;;  %v327_v6 = vld [vmem:[%s852_s8 + $0x60] sm:$0xff]  ;;  %v330_v10 = vld [vmem:[%s852_s8 + $0x78] sm:$0xff] }
   0xf   :  { %v605_v8 = vpack.c.bf16 %v328_v7, %v327_v6  ;;  %v608_v11 = vpack.c.bf16 %v330_v10, %v329_v9  ;;  %v426_v12 = vld [vmem:[%s853_s7] ss:$0 sm:$0xff] }
  0x10   :  { %566 = vmatpush3.bf16.msra.mxu1 %v565_v15 }
  0x11   :  { %567 = vmatprep.subr.bf16.mxu1 %v618_v0 }
  0x14   :  { %569 = vmatpush3.bf16.msra.mxu1 %v568_v18 }
  0x15   :  { %570 = vmatprep.subr.bf16.mxu1 %v618_v0 }
  0x18   :  { %572 = vmatpush3.bf16.msra.mxu1 %v571_v21 }
  0x19   :  { %573 = vmatprep.subr.bf16.mxu1 %v618_v0 }
  0x1c   :  { %575 = vmatpush3.bf16.msra.mxu1 %v574_v24 }
  0x1d   :  { %576 = vmatprep.subr.bf16.mxu1 %v618_v0 }
  0x20   :  { %578 = vmatpush3.bf16.msra.mxu1 %v577_v27 }
  0x21   :  { %579 = vmatprep.subr.bf16.mxu1 %v618_v0 }
  0x24   :  { %581 = vmatpush3.bf16.msra.mxu1 %v580_v30 }
  0xda   :  { %v119_v32 = vpop.f32.mrb[0].mxu1 }
  0xdb   :  { %v120_v33 = vadd.f32 %v421_v31, %v119_v32  ;;  %v476_v34 = vpop.f32.mrb[1].mxu1 }
  0xdd   :  { %v123_v35 = vmax.f32 %v120_v33, 0.0 }
  0xdf   :  { %510 = vmatmul.mubr.f32.vlgmr.msra.gmra.mrb[2].mxu1 %v123_v35 }
 0x1b2   :  { %v213_v37 = vpop.f32.mrb[2].mxu1 }
 0x1b3   :  { %v214_v38 = vadd.f32 %v424_v36, %v213_v37  ;;  %v511_v39 = vpop.f32.mrb[3].mxu1 }
 0x1b5   :  { %v425_v40 = vclamps-f32 %v214_v38, 10.0 }
 0x1b7   :  { %v219_v41 = vmul.f32 0.5, %v425_v40 }
 0x1b9   :  { %v220_v45 = vmul.f32 1.442695, %v219_v41 }
 0x1bb   :  { %616 = vpow2.f32 %v220_v45 }
 0x1c5   :  { %v617_v46 = vpop.eup %616 }
 0x1c6   :  { %224 = vrot.lane.b32.xlu0 %v617_v46, %s622_s5 }
 0x1ca   :  { %409 = vrot.lane.b32.xlu0 %v214_v38, %s623_s13 }
 0x238   :  { %v225_v50 = vpop.permute.xlu0 %224 }
 0x239   :  { %v227_v51 = vmul.f32 %v225_v50, %v222_v47 }
 0x23b   :  { %v228_v53 = vadd.f32 %v227_v51, %v214_v38 }
 0x23c   :  { %v410_v20 = vpop.permute.xlu0 %409 }
 0x23d   :  { %517 = vmatmul.mubr.msk.f32.vlgmr.msra.gmra.mrb[0].mxu0 %vm45_vm4, %v228_v53 }
 0x23e   :  { %588 = vmatpush3.bf16.msra.mxu0 %v587_v52  ;;  %551 = vmatprep.mubr.msk.f32.mxu0 %vm620_vm3, %v621_v5  ;;  %v602_v5 = vpack.c.bf16 %v326_v4, %v325_v3 }
 0x23f   :  { %589 = vmatprep.subr.bf16.mxu0 %v618_v0 }
 0x242   :  { %591 = vmatpush3.bf16.msra.mxu0 %v590_v56 }
 0x243   :  { %592 = vmatprep.subr.bf16.mxu0 %v618_v0 }
 0x246   :  { %594 = vmatpush3.bf16.msra.mxu0 %v593_v59 }
 0x247   :  { %595 = vmatprep.subr.bf16.mxu0 %v618_v0 }
 0x24a   :  { %597 = vmatpush3.bf16.msra.mxu0 %v596_v62 }
 0x24b   :  { %598 = vmatprep.subr.bf16.mxu0 %v618_v0 }
 0x24e   :  { %600 = vmatpush3.bf16.msra.mxu0 %v599_v2 }
 0x24f   :  { %601 = vmatprep.subr.bf16.mxu0 %v618_v0 }
 0x252   :  { %603 = vmatpush3.bf16.msra.mxu0 %v602_v5 }
 0x253   :  { %604 = vmatprep.subr.bf16.mxu0 %v618_v0 }
 0x256   :  { %606 = vmatpush3.bf16.msra.mxu0 %v605_v8 }
 0x257   :  { %607 = vmatprep.subr.bf16.mxu0 %v618_v0  ;;  %v429_v0 = vld [vmem:[%s854_s9] ss:$0 sm:$0xff] }
 0x25a   :  { %609 = vmatpush3.bf16.msra.mxu0 %v608_v11 }
 0x310   :  { %v310_v13 = vpop.f32.mrb[0].mxu0 }
 0x311   :  { %v311_v14 = vadd.f32 %v426_v12, %v310_v13  ;;  %v518_v15 = vpop.f32.mrb[1].mxu0 }
 0x313   :  { %v314_v16 = vmax.f32 %v311_v14, 0.0 }
 0x315   :  { %552 = vmatmul.mubr.f32.vlgmr.msra.gmra.mrb[2].mxu0 %v314_v16 }
 0x3e8   :  { %v404_v17 = vpop.f32.mrb[2].mxu0 }
 0x3e9   :  { %v405_v18 = vadd.f32 %v429_v0, %v404_v17  ;;  %v553_v19 = vpop.f32.mrb[3].mxu0 }
 0x3eb   :  { %v412_v21 = vsel %vm45_vm4, %v405_v18, %v410_v20 }
 0x3ec   :  { %v414_v22 = vsel %vm413_vm5, %v412_v21, %v410_v20 }
 0x3ed   :  { %416 = vst.msk [vmem:[%s855_s10] sm:$0xff] %vm415_vm6, %v414_v22 }

</bundles_post_ra>
